<compile_context>
chip_gen: v5e
topology: v5e:2x2
jax: 0.10.0
libtpu: 0.0.40
codegen_flags: <defaults>
</compile_context>

<pallas_src>
import functools
import math

import jax
import jax.numpy as jnp
import numpy as np
from jax.experimental import pallas as pl
from jax.experimental.pallas import tpu as pltpu


# --------------------------------------------------------------------------- #
# Kernels
# --------------------------------------------------------------------------- #
def _pool_add_kernel(out_ref, inp_ref, p_ref, res_ref, *, inv_area):
    """res = out + avg_pool(inp) for one (batch-tile, channel-tile) block.

    out_ref/res_ref: (bt, ct, Lout)   inp_ref: (bt, ct, Lin)   p_ref: (Lin, Lout)
    p_ref is a bf16 0/1 window-membership matrix (block-diagonal when g
    channels are folded into the lane dim), so `x @ P` is the window *sum*;
    one single-pass bf16 MXU matmul with f32 accumulation, then a compile-time
    1/(s*s) scale.  The matmul stays hidden under the HBM stream.
    """
    bt, ct, lin = inp_ref.shape
    lout = p_ref.shape[1]
    x = inp_ref[...].reshape(bt * ct, lin).astype(jnp.bfloat16)   # leading-dim collapse: layout-free
    pooled = jnp.dot(x, p_ref[...], preferred_element_type=jnp.float32)
    pooled = pooled.reshape(bt, ct, lout) * inv_area
    res_ref[...] = (out_ref[...].astype(jnp.float32) + pooled).astype(res_ref.dtype)


def _add_kernel(out_ref, inp_ref, res_ref):
    """stride == 1 path: plain residual add, native dtype (bf16 VALU on v6e/v7x)."""
    res_ref[...] = out_ref[...] + inp_ref[...].astype(out_ref.dtype)


# --------------------------------------------------------------------------- #
# Wrapper helpers
# --------------------------------------------------------------------------- #
def _build_pool_matrix(H, W, stride, groups):
    """bf16 (g*H*W, g*Ho*Wo) 0/1 matrix: input pixel -> its pooling window.

    Block-diagonal (kron with eye(g)) when g channels share the lane dim.
    """
    s = stride
    Ho, Wo = H // s, W // s
    p = np.arange(H * W)
    h, w = p // W, p % W
    valid = (h < Ho * s) & (w < Wo * s)                    # floor / ceil_mode=False
    col = np.where(valid, (h // s) * Wo + (w // s), Ho * Wo)
    onehot = (col[:, None] == np.arange(Ho * Wo)[None, :]).astype(np.float32)
    if groups > 1:
        onehot = np.kron(np.eye(groups, dtype=np.float32), onehot)
    return jnp.asarray(onehot, dtype=jnp.bfloat16)


def _sublane_multiple(dtype):
    """vreg-packing width for the second-minor dim: 8 f32, 16 bf16, 32 int8/fp8."""
    return {4: 8, 2: 16, 1: 32}.get(jnp.dtype(dtype).itemsize, 8)


def _choose_group(cin, cout, lane_out):
    """Fold g consecutive channels into the lane dim when Ho*Wo < 128.

    g must divide both Cin and Cout (contiguous, free reshapes on both arrays)
    and leave Cin//g with an 8-aligned channel tile so the out/res BlockSpec
    stays legal.  Returns 1 when not needed or not possible.
    """
    if lane_out >= 128:
        return 1
    cands = [g for g in range(2, math.gcd(cin, cout) + 1)
             if cin % g == 0 and cout % g == 0
             and g * lane_out >= 128 and (cin // g) % 8 == 0]
    if not cands:
        return 1
    # Prefer exact multiples of 128 lanes, then the smallest group.
    cands.sort(key=lambda g: ((g * lane_out) % 128 != 0, g))
    return cands[0]


def _pick_tiles(batch, cgrp, lane_max, itemsize, sub, target_bytes):
    """(bt, ct): biggest tiles with the largest per-buffer block <= target.

    ct is the sublane dim of every block: prefer a divisor of cgrp that is a
    multiple of the dtype packing width (full vregs, unmasked sublane stores),
    else any multiple of 8 (compile-valid), else any divisor (pathological
    channel counts only).  bt grows toward the same budget; when the channel
    axis yields a single grid step we keep >= 2 batch blocks so the pipeline
    overlaps DMA/compute and v7x can shard the grid across its 2 TensorCores.
    """
    divisors = [c for c in range(cgrp, 0, -1) if cgrp % c == 0]
    fits = lambda c: c * lane_max * itemsize <= target_bytes
    ct = next((c for c in divisors if c % sub == 0 and fits(c)), None)
    if ct is None:
        ct = next((c for c in divisors if c % 8 == 0 and fits(c)), None)
    if ct is None:
        # No 8-aligned divisor (e.g. Cin < 8): fall back to any divisor.
        ct = next((c for c in divisors if fits(c)), 1)
    n_cblocks = cgrp // ct
    bt = 1
    for b in range(batch, 0, -1):
        if batch % b or b * ct * lane_max * itemsize > target_bytes:
            continue
        if b == batch and batch > 1 and n_cblocks == 1:
            continue                                  # keep >= 2 grid steps
        bt = b
        break
    return bt, ct


# --------------------------------------------------------------------------- #
# Public entry point
# --------------------------------------------------------------------------- #
_TARGET_TILE_BYTES = 4 << 20            # per-buffer tile budget (double-buffered)
_VMEM_LIMIT_BYTES = 32 * 1024 * 1024    # safe on v5e/v6e (128 MiB) and v7x (64 MiB)


def identity_zero_pad_skip(out, inp, *, in_channels, out_channels, stride):
    """JAX/Pallas equivalent of IdentityZeroPadSkip.forward(out, inp).

    NOTE: result aliases `out` (input_output_aliases={0: 0}) to match the
    PyTorch in-place semantics; donate `out` at the jit boundary so XLA does
    not insert a defensive copy and the zero-padded channels [Cin, Cout) never
    touch HBM.  Pooled values use single-pass bf16 MXU accumulation (exact for
    bf16-representable inputs, ~bf16 rounding otherwise).
    """
    B, Cin, H, W = inp.shape
    Bo, Cout, Ho, Wo = out.shape
    assert Cin == in_channels and Cout == out_channels and Bo == B
    assert out_channels >= in_channels, "zero-channel-pad requires Cout >= Cin"
    s = stride
    if s != 1:
        assert (Ho, Wo) == (H // s, W // s)
    else:
        assert (Ho, Wo) == (H, W)

    HW, HoWo = H * W, Ho * Wo
    itemsize = jnp.dtype(inp.dtype).itemsize
    sub = _sublane_multiple(inp.dtype)

    # Fold g channels into the lane dim when Ho*Wo < 128 (late WRN stages) so
    # every output store is a full 128-lane, unmasked vst.
    g = _choose_group(Cin, Cout, HoWo)
    Lin, Lout = g * HW, g * HoWo
    Cg_in, Cg_out = Cin // g, Cout // g

    # Contiguous (free) reshapes -> lane-dense last dim for every buffer.
    out3 = out.reshape(B, Cg_out, Lout)
    inp3 = inp.reshape(B, Cg_in, Lin)

    bt, ct = _pick_tiles(B, Cg_in, max(Lin, Lout), itemsize, sub, _TARGET_TILE_BYTES)
    grid = (B // bt, Cg_in // ct)

    out_in_spec = pl.BlockSpec((bt, ct, Lout), lambda b, c: (b, c, 0))
    inp_spec = pl.BlockSpec((bt, ct, Lin), lambda b, c: (b, c, 0))
    res_spec = pl.BlockSpec((bt, ct, Lout), lambda b, c: (b, c, 0))

    common = dict(
        out_shape=jax.ShapeDtypeStruct(out3.shape, out.dtype),
        grid=grid,
        out_specs=res_spec,
        # Result aliases `out` (in-place residual add, as in PyTorch).  The
        # grid only covers channel groups of [0, Cin); channels [Cin, Cout)
        # keep out's values through the alias -> no HBM traffic for the pad.
        input_output_aliases={0: 0},
        compiler_params=pltpu.CompilerParams(
            dimension_semantics=("parallel", "parallel"),
            vmem_limit_bytes=_VMEM_LIMIT_BYTES),
    )

    if s != 1:
        pmat = _build_pool_matrix(H, W, s, g)          # bf16, tiny, VMEM-resident
        kernel = functools.partial(_pool_add_kernel, inv_area=1.0 / float(s * s))
        res3 = pl.pallas_call(
            kernel,
            in_specs=[out_in_spec, inp_spec,
                      pl.BlockSpec((Lin, Lout), lambda b, c: (0, 0))],
            **common,
        )(out3, inp3, pmat)
    else:
        res3 = pl.pallas_call(
            _add_kernel,
            in_specs=[out_in_spec, inp_spec],
            **common,
        )(out3, inp3)

    return res3.reshape(out.shape)


# --------------------------------------------------------------------------- #
# Pure-JAX reference (mirrors the PyTorch forward)
# --------------------------------------------------------------------------- #
def _reference(out, inp, *, in_channels, out_channels, stride):
    x = inp
    if stride != 1:
        B, C, H, W = x.shape
        s = stride
        Ho, Wo = H // s, W // s
        x = x[:, :, : Ho * s, : Wo * s].reshape(B, C, Ho, s, Wo, s).mean(axis=(3, 5))
    pad = out_channels - in_channels
    if pad > 0:
        zeros = jnp.zeros((x.shape[0], pad) + x.shape[2:], x.dtype)
        x = jnp.concatenate([x, zeros], axis=1)
    return out + x


def _run_case(key, *, B, in_channels, out_channels, stride, H, W):
    Ho, Wo = H // stride, W // stride
    k1, k2 = jax.random.split(key)
    # Round inputs to bf16-representable values: the kernel pools with a
    # single-pass bf16 MXU matmul, so this keeps the reference check exact.
    inp = jax.random.normal(k1, (B, in_channels, H, W), jnp.float32)
    inp = inp.astype(jnp.bfloat16).astype(jnp.float32)
    out = jax.random.normal(k2, (B, out_channels, Ho, Wo), jnp.float32)
    out = out.astype(jnp.bfloat16).astype(jnp.float32)

    ref = jax.block_until_ready(
        _reference(out, inp, in_channels=in_channels,
                   out_channels=out_channels, stride=stride))

    fn = jax.jit(functools.partial(identity_zero_pad_skip,
                                   in_channels=in_channels,
                                   out_channels=out_channels,
                                   stride=stride),
                 donate_argnums=(0,))         # let XLA truly alias `out` in place
    res = jax.block_until_ready(fn(out, inp))

    assert res.shape == ref.shape and res.dtype == ref.dtype
    np.testing.assert_allclose(np.asarray(res), np.asarray(ref),
                               rtol=1e-5, atol=1e-5)


if __name__ == "__main__":
    key = jax.random.PRNGKey(0)
    k1, k2, k3 = jax.random.split(key, 3)
    # WRN downsampling skip: channels double, spatial halves (ungrouped path).
    _run_case(k1, B=2, in_channels=8, out_channels=16, stride=2, H=16, W=16)
    # Wider downsampling skip with Ho*Wo < 128 -> channel-group lane packing.
    _run_case(k2, B=2, in_channels=32, out_channels=64, stride=2, H=16, W=16)
    # stride == 1 identity skip (pure residual add, grouped lane packing).
    _run_case(k3, B=2, in_channels=16, out_channels=16, stride=1, H=8, W=8)
    print("KERNEL_OK")
</pallas_src>

<mosaic_0001>
module attributes {stable_mosaic.version = 11 : i64} {
  func.func @_pool_add_kernel(%arg0: i32, %arg1: i32, %arg2: memref<1x8x64xf32, #tpu.memory_space<vmem>>, %arg3: memref<1x8x256xf32, #tpu.memory_space<vmem>>, %arg4: memref<256x64xbf16, #tpu.memory_space<vmem>>, %arg5: memref<1x8x64xf32, #tpu.memory_space<vmem>>) attributes {dimension_semantics = [#tpu.dimension_semantics<parallel>, #tpu.dimension_semantics<parallel>], iteration_bounds = array<i64: 2, 1>, scalar_prefetch = 0 : i64, scratch_operands = 0 : i64, tpu.core_type = #tpu.core_type<tc>, window_params = [{transform_indices = @transform_0, window_bounds = array<i64: 1, 8, 64>}, {transform_indices = @transform_1, window_bounds = array<i64: 1, 8, 256>}, {pipeline_mode = #tpu.pipeline_mode<synchronous>, transform_indices = @transform_2, window_bounds = array<i64: 256, 64>}, {transform_indices = @transform_3, window_bounds = array<i64: 1, 8, 64>}]} {
    %c0 = arith.constant 0 : index
    %c0_0 = arith.constant 0 : index
    %c0_1 = arith.constant 0 : index
    %0 = vector.load %arg3[%c0, %c0_0, %c0_1] : memref<1x8x256xf32, #tpu.memory_space<vmem>>, vector<1x8x256xf32>
    %1 = vector.shape_cast %0 : vector<1x8x256xf32> to vector<8x256xf32>
    %2 = arith.truncf %1 : vector<8x256xf32> to vector<8x256xbf16>
    %c0_2 = arith.constant 0 : index
    %c0_3 = arith.constant 0 : index
    %3 = vector.load %arg4[%c0_2, %c0_3] : memref<256x64xbf16, #tpu.memory_space<vmem>>, vector<256x64xbf16>
    %cst = arith.constant dense<0.000000e+00> : vector<8x64xf32>
    %4 = tpu.matmul %2, %3, %cst {dimension_numbers = #tpu.dot_dimension_numbers<[1], [0], [0], [1], [0, 0, 1, 1], [], []>} : vector<8x256xbf16>, vector<256x64xbf16>, vector<8x64xf32> -> vector<8x64xf32>
    %5 = vector.shape_cast %4 : vector<8x64xf32> to vector<1x8x64xf32>
    %cst_4 = arith.constant 2.500000e-01 : f32
    %6 = vector.broadcast %cst_4 : f32 to vector<1x8x64xf32>
    %7 = arith.mulf %5, %6 : vector<1x8x64xf32>
    %c0_5 = arith.constant 0 : index
    %c0_6 = arith.constant 0 : index
    %c0_7 = arith.constant 0 : index
    %8 = vector.load %arg2[%c0_5, %c0_6, %c0_7] : memref<1x8x64xf32, #tpu.memory_space<vmem>>, vector<1x8x64xf32>
    %9 = arith.addf %8, %7 : vector<1x8x64xf32>
    %c0_8 = arith.constant 0 : index
    %c0_9 = arith.constant 0 : index
    %c0_10 = arith.constant 0 : index
    %10 = vector.load %arg5[%c0_8, %c0_9, %c0_10] : memref<1x8x64xf32, #tpu.memory_space<vmem>>, vector<1x8x64xf32>
    tpu.vector_store %arg5[%c0_8, %c0_9, %c0_10], %9 {strides = array<i32>} : memref<1x8x64xf32, #tpu.memory_space<vmem>>, vector<1x8x64xf32>,
    return
  }
  func.func @transform_0(%arg0: i32, %arg1: i32) -> (i32, i32, i32) {
    %c0_i32 = arith.constant 0 : i32
    %c0_i32_0 = arith.constant 0 : i32
    return %arg0, %arg1, %c0_i32 : i32, i32, i32
  }
  func.func @transform_1(%arg0: i32, %arg1: i32) -> (i32, i32, i32) {
    %c0_i32 = arith.constant 0 : i32
    %c0_i32_0 = arith.constant 0 : i32
    return %arg0, %arg1, %c0_i32 : i32, i32, i32
  }
  func.func @transform_2(%arg0: i32, %arg1: i32) -> (i32, i32) {
    %c0_i32 = arith.constant 0 : i32
    %c0_i32_0 = arith.constant 0 : i32
    %c0_i32_1 = arith.constant 0 : i32
    return %c0_i32, %c0_i32_0 : i32, i32
  }
  func.func @transform_3(%arg0: i32, %arg1: i32) -> (i32, i32, i32) {
    %c0_i32 = arith.constant 0 : i32
    %c0_i32_0 = arith.constant 0 : i32
    return %arg0, %arg1, %c0_i32 : i32, i32, i32
  }
}

</mosaic_0001>

<bundles_post_ra>
// kernel: identity_zero_pad_skip.1
= control target key start
LH: loop header
LB: loop body
LE: loop exit
PB: predicated region body
PF: predicated region fallthrough
CT: control target
= control target key end

     0   :  { %s667_s12 = smov 0   ;;  %s669_s13 = smov 0   ;;  %s751_s0 = inlined_call_operand.vmem [shape: f32[2,16,64], index: 0, kind: input, shape index: {}, may-alias: {0,3}]   ;;  %s752_s1 = inlined_call_operand.vmem [shape: f32[2,8,256], index: 1, kind: input, shape index: {}]   ;;  %s753_s2 = inlined_call_operand.vmem [shape: bf16[256,64], index: 2, kind: input, shape index: {}]   ;;  %s754_s3 = inlined_call_operand.vmem [shape: f32[2,16,64], index: 3, kind: output, shape index: {}, may-alias: {0,3}]  }
   0x1   :  { %s671_s14 = smov 0  }
   0x2 LB: > { %s25_s15 = sadd.s32 1, %s641_s13  ;;  %p507_p0 = scmp.ge.s32.totalorder %s645_s14, 1  ;;  %s645_s14 = sphi %s671_s14, %s13_s14   ;;  %s641_s13 = sphi %s669_s13, %s756_s13   ;;  %s637_s12 = sphi %s667_s12, %s755_s12  }
   0x3   : > { %p27_p1 = scmp.ge.s32.totalorder %s25_s15, 2  ;;  %p172_p2 = scmp.lt.s32.totalorder %s645_s14, 3 }
   0x5   : > { %s758_s15 = smov (%p27_p1, %s25_s15), 0  ;;  %p173_p3 = pnand %p507_p0, %p172_p2 }
   0x6   : > { %p211_p4 = scmp.lt.s32.totalorder (!%p173_p3), %s637_s12, 1 }
   0x7   : > { %176 = sbr.rel (%p173_p3) target bundleno = 179 (0xb3), region = 32 }
   0xc   : > { %v590_v0 = vld [vmem:[%s753_s2 + $0x38] sm:$0xff]  ;;  %v589_v2 = vld [vmem:[%s753_s2 + $0x30] sm:$0xff]  ;;  %v588_v4 = vld [vmem:[%s753_s2 + $0x28] sm:$0xff]  ;;  %s760_s12 = smov (!%p211_p4, %s637_s12), 1  ;;  %vm397_vm0 = vcmask 523264  }
   0xd   : > { %v598_v1 = vld [vmem:[%s753_s2 + $0x78] sm:$0xff]  ;;  %368 = vmatpush.bf16.msra.mxu0 %v590_v0  ;;  %v597_v3 = vld [vmem:[%s753_s2 + $0x70] sm:$0xff]  ;;  %v596_v5 = vld [vmem:[%s753_s2 + $0x68] sm:$0xff]  ;;  %s580_s17 = sshll.u32 %s760_s12, 4 }
   0xe   : > { %381 = vmatpush.bf16.msra.mxu1 %v598_v1  ;;  %v587_v6 = vld [vmem:[%s753_s2 + $0x20] sm:$0xff]  ;;  %v586_v8 = vld [vmem:[%s753_s2 + $0x18] sm:$0xff]  ;;  %v585_v10 = vld [vmem:[%s753_s2 + $0x10] sm:$0xff]  ;;  %s227_s24 = scalar_lea.vmem %s752_s1, %s580_s17  ;;  %s218_s30 = scalar_lea.vmem %s751_s0, %s580_s17 }
   0xf   : > { %v595_v7 = vld [vmem:[%s753_s2 + $0x60] sm:$0xff]  ;;  %v594_v9 = vld [vmem:[%s753_s2 + $0x58] sm:$0xff]  ;;  %v593_v11 = vld [vmem:[%s753_s2 + $0x50] sm:$0xff]  ;;  %s235_s6 = scalar_lea.vmem %s754_s3, %s580_s17 }
  0x10   : > { %v584_v12 = vld [vmem:[%s753_s2 + $0x8] sm:$0xff]  ;;  %v583_v14 = vld [vmem:[%s753_s2] sm:$0xff] }
  0x11   : > { %369 = vmatpush.bf16.msra.mxu0 %v589_v2  ;;  %v592_v13 = vld [vmem:[%s753_s2 + $0x48] sm:$0xff]  ;;  %v591_v15 = vld [vmem:[%s753_s2 + $0x40] sm:$0xff] }
  0x12   : > { %382 = vmatpush.bf16.msra.mxu1 %v597_v3  ;;  %v236_v16 = vld [vmem:[%s227_s24] sm:$0xff]  ;;  %v237_v17 = vld [vmem:[%s227_s24 + $0x8] sm:$0xff] }
  0x13   : > { %v238_v18 = vpack.c.bf16 %v236_v16, %v236_v16  ;;  %v239_v19 = vpack.c.bf16 %v237_v17, %v237_v17  ;;  %v395_v23 = vld [vmem:[%s218_s30] sm:$0xff] }
  0x15   : > { %370 = vmatpush.bf16.msra.mxu0 %v588_v4 }
  0x16   : > { %383 = vmatpush.bf16.msra.mxu1 %v596_v5 }
  0x19   : > { %371 = vmatpush.bf16.msra.mxu0 %v587_v6 }
  0x1a   : > { %384 = vmatpush.bf16.msra.mxu1 %v595_v7 }
  0x1d   : > { %372 = vmatpush.bf16.msra.mxu0 %v586_v8 }
  0x1e   : > { %385 = vmatpush.bf16.msra.mxu1 %v594_v9 }
  0x21   : > { %373 = vmatpush.bf16.msra.mxu0 %v585_v10 }
  0x22   : > { %386 = vmatpush.bf16.msra.mxu1 %v593_v11 }
  0x25   : > { %374 = vmatpush.bf16.msra.mxu0 %v584_v12 }
  0x26   : > { %387 = vmatpush.bf16.msra.mxu1 %v592_v13 }
  0x29   : > { %375 = vmatpush.bf16.msra.mxu0 %v583_v14 }
  0x2a   : > { %388 = vmatpush.bf16.msra.mxu1 %v591_v15 }
  0x2c   : > { %376 = vmatmul.bf16.vlgmr.msra.gmra.mxu0 %v238_v18 }
  0x2d   : > { %389 = vmatmul.bf16.vlgmr.msra.gmra.mxu1 %v239_v19 }
  0xa9   : > { %v377_v20 = vpop.f32.mrf.mxu0 }
  0xaa   : > { %v390_v21 = vpop.f32.mrf.mxu1 }
  0xab   : > { %v391_v22 = vadd.f32 %v390_v21, %v377_v20 }
  0xad   : > { %v394_v24 = vmul.f32 0.25, %v391_v22 }
  0xaf   : > { %v396_v25 = vadd.f32 %v395_v23, %v394_v24 }
  0xb1   : > { %398 = vst.msk [vmem:[%s235_s6] sm:$0xff] %vm397_vm0, %v396_v25  ;;  %v379_v26 = vpop.f32.mrf.mxu0 }
  0xb2   : > { %v392_v27 = vpop.f32.mrf.mxu1 }
  0xb3 PF: > { %s13_s14 = sadd.s32 1, %s645_s14   ;;  %s755_s12 = smov %s641_s13 }
  0xb4   : > { %p10_p5 = scmp.ge.s32.totalorder %s13_s14, 4   ;;  %s756_s13 = smov %s758_s15 }
  0xb6   :  { %12 = sbr.rel (!%p10_p5) target bundleno = 2 (0x2), region = 65 }

</bundles_post_ra>
